<compile_context>
chip_gen: v7x
topology: tpu7x:2x2x1
jax: 0.10.0
libtpu: 0.0.40
codegen_flags: <defaults>
</compile_context>

<pallas_src>
import math
import jax
import jax.numpy as jnp
from jax.experimental import pallas as pl
from jax.experimental.pallas import tpu as pltpu


def _round_up(a, b):
    return (a + b - 1) // b * b


def _chip_config():
    """Pick MXU dtype / tile / VMEM-limit defaults per TPU generation."""
    kind = ""
    try:
        kind = jax.devices()[0].device_kind.lower()
    except Exception:
        pass
    if any(t in kind for t in ("v5 lite", "v5e", "v6 lite", "v6e")):
        # int8 MXU + large M tile; 128 MiB physical VMEM.
        return dict(int8_mxu=True, tm=512, tn=256,
                    vmem_limit_bytes=64 * 1024 * 1024)
    if "v7" in kind:
        # No integer MXU; only 64 MiB VMEM per core -> keep footprint modest.
        return dict(int8_mxu=False, tm=256, tn=256,
                    vmem_limit_bytes=40 * 1024 * 1024)
    # Unknown / other generations: safe bf16 defaults (known-good).
    return dict(int8_mxu=False, tm=256, tn=256,
                vmem_limit_bytes=48 * 1024 * 1024)


def _make_kernel(use_int8):
    def kernel(x_ref, sign_ref, alpha_ref, bias_ref, o_ref, q_ref, s_ref):
        # Recompute the quantized activation tile only when the M block changes
        # (j == 0); it is then reused for every N tile of this row block.
        @pl.when(pl.program_id(1) == 0)
        def _():
            x = x_ref[...].astype(jnp.float32)                    # (tm, K)
            max_abs = jnp.maximum(
                jnp.max(jnp.abs(x), axis=-1, keepdims=True), 1e-6)
            inv = 7.0 / max_abs                                   # (tm,1) divides only
            q = jnp.clip(jnp.round(x * inv), -8.0, 7.0)           # ints in [-8,7]
            if use_int8:
                q_ref[...] = q.astype(jnp.int32).astype(jnp.int8)
            else:
                q_ref[...] = q.astype(jnp.bfloat16)
            s_ref[...] = max_abs

        if use_int8:
            # Exact small-integer matmul on the int8 MXU (v5e / v6e).
            y = jnp.dot(q_ref[...], sign_ref[...],
                        preferred_element_type=jnp.int32).astype(jnp.float32)
        else:
            # bf16 MXU path (safe everywhere, incl. v7x); operands are exact.
            sign = sign_ref[...].astype(jnp.float32).astype(jnp.bfloat16)
            y = jnp.dot(q_ref[...], sign, preferred_element_type=jnp.float32)

        # Fold the scales back in: (max_abs/7) per row, alpha per column, + bias.
        y = y * (s_ref[...] * alpha_ref[...]) + bias_ref[...]
        o_ref[...] = y.astype(o_ref.dtype)

    return kernel


def prepare_bitlinear_weight(weight, bias=None):
    """Weight-only preprocessing (global-threshold ternarization).

    Depends only on the parameters -> cache the result across forward calls.
    Returns (sign_kn int8 (K, N), alpha/7 f32 (N,), bias f32 (N,)).
    """
    w = weight.astype(jnp.float32)
    absw = jnp.abs(w)
    thresh = 0.05 * jnp.mean(absw)                        # global scalar
    sign = jnp.where(absw < thresh, 0.0, jnp.sign(w))     # (N, K) in {-1,0,1}
    alpha7 = jnp.mean(absw, axis=1) / 7.0                 # (N,)  (1/7 pre-folded)
    sign_kn = sign.T.astype(jnp.int8)                     # (K, N), exact
    N = weight.shape[0]
    if bias is None:
        bias = jnp.zeros((N,), dtype=jnp.float32)
    return sign_kn, alpha7.astype(jnp.float32), bias.astype(jnp.float32)


def bitlinear(x, weight, bias=None, *, params=None, tm=None, tn=None):
    """x: (..., K), weight: (N, K), bias: (N,) or None -> (..., N)."""
    orig_shape = x.shape
    K = orig_shape[-1]
    N = weight.shape[0]

    cfg = _chip_config()
    use_int8 = cfg["int8_mxu"]
    tm = cfg["tm"] if tm is None else tm
    tn = cfg["tn"] if tn is None else tn

    if params is None:
        params = prepare_bitlinear_weight(weight, bias)
    sign_kn, alpha7, bias_v = params

    x2d = x.reshape(-1, K)                  # keep native dtype (no f32 upcast)
    M = x2d.shape[0]

    # ---- tile sizes & (optional) padding ------------------------------------
    tm = min(tm, _round_up(M, 8))
    tn = min(tn, _round_up(N, 128))
    Mp = _round_up(M, tm)
    Np = _round_up(N, tn)

    xp = x2d if Mp == M else jnp.pad(x2d, ((0, Mp - M), (0, 0)))
    if Np == N:
        sp = sign_kn
        ap = alpha7.reshape(1, N)
        bp = bias_v.reshape(1, N)
    else:
        sp = jnp.pad(sign_kn, ((0, 0), (0, Np - N)))
        ap = jnp.pad(alpha7, (0, Np - N)).reshape(1, Np)
        bp = jnp.pad(bias_v, (0, Np - N)).reshape(1, Np)

    q_dtype = jnp.int8 if use_int8 else jnp.bfloat16

    out = pl.pallas_call(
        _make_kernel(use_int8),
        out_shape=jax.ShapeDtypeStruct((Mp, Np), x.dtype),
        grid_spec=pltpu.PrefetchScalarGridSpec(
            num_scalar_prefetch=0,
            grid=(Mp // tm, Np // tn),
            in_specs=[
                pl.BlockSpec((tm, K), lambda i, j: (i, 0)),   # activation tile
                pl.BlockSpec((K, tn), lambda i, j: (0, j)),   # ternary sign (int8)
                pl.BlockSpec((1, tn), lambda i, j: (0, j)),   # alpha/7 per out-col
                pl.BlockSpec((1, tn), lambda i, j: (0, j)),   # bias    per out-col
            ],
            out_specs=pl.BlockSpec((tm, tn), lambda i, j: (i, j)),
            scratch_shapes=[
                pltpu.VMEM((tm, K), q_dtype),       # cached quantized activations
                pltpu.VMEM((tm, 1), jnp.float32),   # cached per-row max_abs
            ],
        ),
        compiler_params=pltpu.CompilerParams(
            dimension_semantics=("parallel", "arbitrary"),
            vmem_limit_bytes=cfg["vmem_limit_bytes"]),
    )(xp, sp, ap, bp)

    out = out[:M, :N]
    return out.reshape(*orig_shape[:-1], N)


def bitlinear_ref(x, weight, bias):
    # pure-JAX reference of the PyTorch forward (no Pallas)
    max_abs = jnp.maximum(jnp.max(jnp.abs(x), axis=-1, keepdims=True), 1e-6)
    xq = jnp.clip(jnp.round(x / max_abs * 7.0), -8.0, 7.0) * max_abs / 7.0
    absw = jnp.abs(weight)
    thresh = 0.05 * jnp.mean(absw)
    wq = jnp.where(absw < thresh, 0.0, jnp.sign(weight)) * jnp.mean(
        absw, axis=1, keepdims=True)
    y = xq @ wq.T
    if bias is not None:
        y = y + bias
    return y


if __name__ == "__main__":
    key = jax.random.PRNGKey(0)
    batch, seq, in_f, out_f = 2, 8, 32, 64

    kx, kw = jax.random.split(key)
    x = jax.random.normal(kx, (batch, seq, in_f), dtype=jnp.float32)
    # deterministic param init matching BitLinear.__init__: randn/sqrt(in_f), zero bias
    weight = jax.random.normal(kw, (out_f, in_f), dtype=jnp.float32) / math.sqrt(in_f)
    bias = jnp.zeros((out_f,), dtype=jnp.float32)

    # weight preprocessing is hoisted and could be cached by the caller
    params = prepare_bitlinear_weight(weight, bias)

    out = jax.block_until_ready(bitlinear(x, weight, bias, params=params))
    ref = bitlinear_ref(x.reshape(-1, in_f), weight, bias).reshape(batch, seq, out_f)

    assert out.shape == (batch, seq, out_f)
    # tolerance covers the (mathematically equivalent) fold-out-the-scales
    # reordering of the matmul vs the literal reference computation order.
    assert jnp.allclose(out, ref, atol=1e-4, rtol=1e-4), float(
        jnp.max(jnp.abs(out - ref)))
    print("KERNEL_OK")
</pallas_src>

<mosaic_0001>
module attributes {stable_mosaic.version = 11 : i64} {
  func.func @kernel(%arg0: i32, %arg1: i32, %arg2: memref<16x32xf32, #tpu.memory_space<vmem>>, %arg3: memref<32x128xi8, #tpu.memory_space<vmem>>, %arg4: memref<1x128xf32, #tpu.memory_space<vmem>>, %arg5: memref<1x128xf32, #tpu.memory_space<vmem>>, %arg6: memref<16x128xf32, #tpu.memory_space<vmem>>, %arg7: memref<16x32xbf16, #tpu.memory_space<vmem>>, %arg8: memref<16x1xf32, #tpu.memory_space<vmem>>) attributes {dimension_semantics = [#tpu.dimension_semantics<parallel>, #tpu.dimension_semantics<arbitrary>], iteration_bounds = array<i64: 1, 1>, scalar_prefetch = 0 : i64, scratch_operands = 2 : i64, tpu.core_type = #tpu.core_type<tc>, window_params = [{transform_indices = @transform_0, window_bounds = array<i64: 16, 32>}, {transform_indices = @transform_1, window_bounds = array<i64: 32, 128>}, {transform_indices = @transform_2, window_bounds = array<i64: 1, 128>}, {transform_indices = @transform_3, window_bounds = array<i64: 1, 128>}, {transform_indices = @transform_4, window_bounds = array<i64: 16, 128>}]} {
    %c0_i32 = arith.constant 0 : i32
    %0 = arith.cmpi eq, %arg1, %c0_i32 : i32
    %1 = arith.extui %0 : i1 to i32
    %c0_i32_0 = arith.constant 0 : i32
    %2 = arith.cmpi ne, %1, %c0_i32_0 : i32
    scf.if %2 {
      %c0_12 = arith.constant 0 : index
      %c0_13 = arith.constant 0 : index
      %18 = vector.load %arg2[%c0_12, %c0_13] : memref<16x32xf32, #tpu.memory_space<vmem>>, vector<16x32xf32>
      %19 = math.absf %18 : vector<16x32xf32>
      %cst_14 = arith.constant dense<0xFF800000> : vector<16xf32>
      %20 = vector.multi_reduction <maximumf>, %19, %cst_14 [1] : vector<16x32xf32> to vector<16xf32>
      %21 = vector.shape_cast %20 : vector<16xf32> to vector<16x1xf32>
      %cst_15 = arith.constant 9.99999997E-7 : f32
      %22 = vector.broadcast %cst_15 : f32 to vector<16x1xf32>
      %23 = arith.maximumf %21, %22 : vector<16x1xf32>
      %cst_16 = arith.constant 7.000000e+00 : f32
      %24 = vector.broadcast %cst_16 : f32 to vector<16x1xf32>
      %25 = arith.divf %24, %23 : vector<16x1xf32>
      %26 = vector.broadcast %25 : vector<16x1xf32> to vector<16x32xf32>
      %27 = arith.mulf %18, %26 : vector<16x32xf32>
      %28 = math.roundeven %27 : vector<16x32xf32>
      %cst_17 = arith.constant -8.000000e+00 : f32
      %cst_18 = arith.constant 7.000000e+00 : f32
      %29 = vector.broadcast %cst_17 : f32 to vector<16x32xf32>
      %30 = arith.maximumf %29, %28 : vector<16x32xf32>
      %31 = vector.broadcast %cst_18 : f32 to vector<16x32xf32>
      %32 = arith.minimumf %31, %30 : vector<16x32xf32>
      %33 = arith.truncf %32 : vector<16x32xf32> to vector<16x32xbf16>
      %c0_19 = arith.constant 0 : index
      %c0_20 = arith.constant 0 : index
      %34 = vector.load %arg7[%c0_19, %c0_20] : memref<16x32xbf16, #tpu.memory_space<vmem>>, vector<16x32xbf16>
      tpu.vector_store %arg7[%c0_19, %c0_20], %33 {strides = array<i32>} : memref<16x32xbf16, #tpu.memory_space<vmem>>, vector<16x32xbf16>,
      %c0_21 = arith.constant 0 : index
      %c0_22 = arith.constant 0 : index
      %35 = vector.load %arg8[%c0_21, %c0_22] : memref<16x1xf32, #tpu.memory_space<vmem>>, vector<16x1xf32>
      tpu.vector_store %arg8[%c0_21, %c0_22], %23 {strides = array<i32>} : memref<16x1xf32, #tpu.memory_space<vmem>>, vector<16x1xf32>,
    } else {
    }
    %c0 = arith.constant 0 : index
    %c0_1 = arith.constant 0 : index
    %3 = vector.load %arg3[%c0, %c0_1] : memref<32x128xi8, #tpu.memory_space<vmem>>, vector<32x128xi8>
    %4 = arith.sitofp %3 : vector<32x128xi8> to vector<32x128xf32>
    %5 = arith.truncf %4 : vector<32x128xf32> to vector<32x128xbf16>
    %c0_2 = arith.constant 0 : index
    %c0_3 = arith.constant 0 : index
    %6 = vector.load %arg7[%c0_2, %c0_3] : memref<16x32xbf16, #tpu.memory_space<vmem>>, vector<16x32xbf16>
    %cst = arith.constant dense<0.000000e+00> : vector<16x128xf32>
    %7 = tpu.matmul %6, %5, %cst {dimension_numbers = #tpu.dot_dimension_numbers<[1], [0], [0], [1], [0, 0, 1, 1], [], []>} : vector<16x32xbf16>, vector<32x128xbf16>, vector<16x128xf32> -> vector<16x128xf32>
    %c0_4 = arith.constant 0 : index
    %c0_5 = arith.constant 0 : index
    %8 = vector.load %arg8[%c0_4, %c0_5] : memref<16x1xf32, #tpu.memory_space<vmem>>, vector<16x1xf32>
    %c0_6 = arith.constant 0 : index
    %c0_7 = arith.constant 0 : index
    %9 = vector.load %arg4[%c0_6, %c0_7] : memref<1x128xf32, #tpu.memory_space<vmem>>, vector<1x128xf32>
    %10 = vector.broadcast %8 : vector<16x1xf32> to vector<16x128xf32>
    %11 = vector.broadcast %9 : vector<1x128xf32> to vector<16x128xf32>
    %12 = arith.mulf %10, %11 : vector<16x128xf32>
    %13 = arith.mulf %7, %12 : vector<16x128xf32>
    %c0_8 = arith.constant 0 : index
    %c0_9 = arith.constant 0 : index
    %14 = vector.load %arg5[%c0_8, %c0_9] : memref<1x128xf32, #tpu.memory_space<vmem>>, vector<1x128xf32>
    %15 = vector.broadcast %14 : vector<1x128xf32> to vector<16x128xf32>
    %16 = arith.addf %13, %15 : vector<16x128xf32>
    %c0_10 = arith.constant 0 : index
    %c0_11 = arith.constant 0 : index
    %17 = vector.load %arg6[%c0_10, %c0_11] : memref<16x128xf32, #tpu.memory_space<vmem>>, vector<16x128xf32>
    tpu.vector_store %arg6[%c0_10, %c0_11], %16 {strides = array<i32>} : memref<16x128xf32, #tpu.memory_space<vmem>>, vector<16x128xf32>,
    return
  }
  func.func @transform_0(%arg0: i32, %arg1: i32) -> (i32, i32) {
    %c0_i32 = arith.constant 0 : i32
    %c0_i32_0 = arith.constant 0 : i32
    return %arg0, %c0_i32 : i32, i32
  }
  func.func @transform_1(%arg0: i32, %arg1: i32) -> (i32, i32) {
    %c0_i32 = arith.constant 0 : i32
    %c0_i32_0 = arith.constant 0 : i32
    return %c0_i32, %arg1 : i32, i32
  }
  func.func @transform_2(%arg0: i32, %arg1: i32) -> (i32, i32) {
    %c0_i32 = arith.constant 0 : i32
    %c0_i32_0 = arith.constant 0 : i32
    return %c0_i32, %arg1 : i32, i32
  }
  func.func @transform_3(%arg0: i32, %arg1: i32) -> (i32, i32) {
    %c0_i32 = arith.constant 0 : i32
    %c0_i32_0 = arith.constant 0 : i32
    return %c0_i32, %arg1 : i32, i32
  }
  func.func @transform_4(%arg0: i32, %arg1: i32) -> (i32, i32) {
    %c0_i32 = arith.constant 0 : i32
    return %arg0, %arg1 : i32, i32
  }
}

</mosaic_0001>

<bundles_post_ra>
// kernel: tpu_custom_call.1
= control target key start
LH: loop header
LB: loop body
LE: loop exit
PB: predicated region body
PF: predicated region fallthrough
CT: control target
= control target key end

     0   :  { %9 = vsyncpa [#allocation5], 0  ;;  %s367_s0 = inlined_call_operand.hbm [shape: f32[16,32], index: 0, kind: input, shape index: {}]   ;;  %s368_s1 = inlined_call_operand.hbm [shape: s8[32,128], index: 1, kind: input, shape index: {}]   ;;  %s369_s2 = inlined_call_operand.vmem [shape: f32[1,128], index: 2, kind: input, shape index: {}]   ;;  %s370_s3 = inlined_call_operand.vmem [shape: f32[1,128], index: 3, kind: input, shape index: {}]   ;;  %s371_s4 = inlined_call_operand.hbm [shape: f32[16,128], index: 4, kind: output, shape index: {}]  }
   0x1   :  { %10 = vsyncpa [#allocation8], 0 }
   0x2   :  { %11 = vsyncpa [#allocation6], 0  ;;  %s282_s15 = smov [#allocation4]   ;;  %s210_s19 = scalar_lea.hbm %s367_s0, 256 }
   0x3   :  { %s17_s16 = sshll.u32 %s282_s15, 4  ;;  %p211_p0 = scmp.ne.s32.totalorder %s367_s0, %s210_s19  ;;  %s18_s16 = int_to_ptr.vmem [resolvable:$true] %s17_s16 }
   0x4   :  { %p214_p1 = scmp.lt.u32.totalorder %s210_s19, %s367_s0 }
   0x6   :  { %p216_p2 = pnand %p214_p1, %p211_p0 }
   0x8   :  { %219 = shalt.err (!%p216_p2)
}
   0x9   :  { %s220_s24 = scalar_lea.vmem %s18_s16, 256  ;;  %p225_p4 = scmp.lt.s32.totalorder %s18_s16, %s18_s16 }
   0xa   :  { %p221_p3 = scmp.ne.s32.totalorder %s18_s16, %s220_s24  ;;  %p226_p5 = scmp.lt.s32.totalorder %s220_s24, %s220_s24 }
   0xc   :  { %p227_p6 = por %p226_p5, %p225_p4 }
   0xe   :  { %p228_p7 = pnand %p227_p6, %p221_p3 }
  0x10   :  { %231 = shalt.err (!%p228_p7)
}
  0x11   :  { %s283_s25 = smov 128   ;;  %s284_s26 = smov 8  }
  0x12   :  { %23 = dma.hbm_to_vmem [thread:$0]  %s367_s0, 256, %s18_s16, [#allocation5], %s283_s25, %s283_s25, %s284_s26  }
  0x13   :  { %s285_s29 = smov [#allocation7]   ;;  %s232_s7 = scalar_lea.hbm %s368_s1, 128 }
  0x14   :  { %s30_s30 = sshll.u32 %s285_s29, 4  ;;  %p233_p8 = scmp.ne.s32.totalorder %s368_s1, %s232_s7  ;;  %s31_s30 = int_to_ptr.vmem [resolvable:$true] %s30_s30 }
  0x15   :  { %p236_p9 = scmp.lt.u32.totalorder %s232_s7, %s368_s1 }
  0x17   :  { %p238_p10 = pnand %p236_p9, %p233_p8 }
  0x19   :  { %241 = shalt.err (!%p238_p10)
}
  0x1a   :  { %s242_s12 = scalar_lea.vmem %s31_s30, 128  ;;  %p247_p12 = scmp.lt.s32.totalorder %s31_s30, %s31_s30 }
  0x1b   :  { %p243_p11 = scmp.ne.s32.totalorder %s31_s30, %s242_s12  ;;  %p248_p13 = scmp.lt.s32.totalorder %s242_s12, %s242_s12 }
  0x1d   :  { %p249_p0 = por %p248_p13, %p247_p12 }
  0x1f   :  { %p250_p1 = pnand %p249_p0, %p243_p11 }
  0x21   :  { %253 = shalt.err (!%p250_p1)
}
  0x22   :  { %33 = dma.hbm_to_vmem [thread:$0]  %s368_s1, 128, %s31_s30, [#allocation8]  }
  0x23   :  { %276 = dma.done.wait [#allocation5], 256  }
  0x24   :  { %277 = vsyncadd [#allocation5], 4294967040 }
  0x25   :  { %278 = dma.done.wait [#allocation8], 128  }
  0x26   :  { %279 = vsyncadd [#allocation8], 4294967168  ;;  %v49_v0 = vld [vmem:[#allocation4] sm:$0xff]  ;;  %vm53_vm0 = vcmask 261120   ;;  %v50_v1 = vld [vmem:[#allocation4 + $0x8] sm:$0xff]  ;;  %v286_v6 = vmov 0  }
  0x27   :  { %v51_v2 = vand.u32 2147483647, %v49_v0  ;;  %v52_v3 = vand.u32 2147483647, %v50_v1  ;;  %204 = vset.pattern.permute.xlu1 %v286_v6  ;;  %205 = vset.pattern.permute.xlu0 %v286_v6  ;;  %v79_v7 = vld [vmem:[#allocation7] sm:$0xff]  ;;  %v287_v9 = vmov 0.0  }
  0x28   :  { %v80_v8 = vunpack.c.l.s8.bf16 %v79_v7  ;;  %186 = vmatprep.subr.bf16.mxu0 %v287_v9  ;;  %v81_v10 = vunpack.c.h.s8.bf16 %v79_v7  ;;  %vm288_vm1 = vmmov 0   ;;  %vm76_vm2 = vcmask 7168   ;;  %v181_v32 = vld [vmem:[%s369_s2] ss:$0 sm:$0xff]  ;;  %s289_s17 = smov [#allocation9]  }
  0x29   :  { %v54_v4 = vsel %vm53_vm0, %v51_v2, -inf  ;;  %v57_v5 = vsel %vm53_vm0, %v52_v3, -inf  ;;  %190 = vmatprep.mubr.msk.bf16.mxu0 %vm288_vm1, %v287_v9  ;;  %v182_v36 = vld [vmem:[%s370_s3] ss:$0 sm:$0xff]  ;;  %s167_s18 = sshll.u32 %s289_s17, 4  ;;  %s168_s18 = int_to_ptr.vmem [resolvable:$true] %s167_s18 }
  0x2a   :  { %55 = vmax.xlane.f32.xlu0 %v54_v4  ;;  %187 = vmatpush3.bf16.msra.mxu0 %v80_v8  ;;  %s254_s2 = scalar_lea.vmem %s168_s18, 256  ;;  %p259_p3 = scmp.lt.s32.totalorder %s168_s18, %s168_s18 }
  0x2b   :  { %188 = vmatprep.subr.bf16.mxu0 %v287_v9  ;;  %p255_p2 = scmp.ne.s32.totalorder %s168_s18, %s254_s2  ;;  %p260_p4 = scmp.lt.s32.totalorder %s254_s2, %s254_s2 }
  0x2d   :  { %p261_p5 = por %p260_p4, %p259_p3 }
  0x2e   :  { %58 = vmax.xlane.f32.xlu0 %v57_v5  ;;  %189 = vmatpush3.bf16.msra.mxu0 %v81_v10 }
  0x2f   :  { %p262_p6 = pnand %p261_p5, %p255_p2 }
  0xb7   :  { %v56_v11 = vpop.xlane.xlu0 %55 }
  0xb8   :  { %v60_v12 = vmax.f32 %v56_v11, 1e-06 }
  0xba   :  { %206 = vrcp.f32 %v60_v12  ;;  %77 = vst.msk [vmem:[#allocation3] sm:$0xff] %vm76_vm2, %v60_v12 }
  0xbb   :  { %v59_v13 = vpop.xlane.xlu0 %58 }
  0xbc   :  { %v61_v14 = vmax.f32 %v59_v13, 1e-06 }
  0xbe   :  { %208 = vrcp.f32 %v61_v14  ;;  %78 = vst.msk [vmem:[#allocation3 + $0x8] sm:$0xff] %vm76_vm2, %v61_v14 }
  0xc1   :  { %v128_v15 = vld [vmem:[#allocation3] sm:$0xff] }
  0xc2   :  { %133 = vperm.xlu1 %204, %v128_v15  }
  0xc4   :  { %v207_v16 = vpop.eup %206 }
  0xc5   :  { %v63_v17 = vmul.f32 7.0, %v207_v16  ;;  %v129_v18 = vld [vmem:[#allocation3 + $0x8] sm:$0xff] }
  0xc6   :  { %138 = vperm.xlu1 %204, %v129_v18  }
  0xc7   :  { %v66_v19 = vmul.f32 %v63_v17, %v49_v0 }
  0xc8   :  { %v209_v20 = vpop.eup %208 }
  0xc9   :  { %v194_v21 = vround.rtne.f32 %v66_v19  ;;  %v65_v22 = vmul.f32 7.0, %v209_v20 }
  0xcb   :  { %v67_v23 = vmul.f32 %v65_v22, %v50_v1  ;;  %v70_v24 = vmax.f32 %v194_v21, -8.0 }
  0xcd   :  { %v195_v25 = vround.rtne.f32 %v67_v23  ;;  %v72_v27 = vmin.f32 %v70_v24, 7.0 }
  0xcf   :  { %v71_v26 = vmax.f32 %v195_v25, -8.0 }
  0xd1   :  { %v73_v28 = vmin.f32 %v71_v26, 7.0 }
  0xd3   :  { %v74_v29 = vpack.c.bf16 %v73_v28, %v72_v27 }
  0xd5   :  { %75 = vst.msk [vmem:[#allocation2] sm:$0xff] %vm53_vm0, %v74_v29 }
  0xdc   :  { %v82_v30 = vld [vmem:[#allocation2] sm:$0xff] }
  0xdd   :  { %191 = vmatmul.mubr.msk.bf16.vlgmr.msra.gmra.mrb[0].mxu0 %vm53_vm0, %v82_v30 }
 0x141   :  { %v134_v31 = vpop.permute.xlu1 %133 }
 0x142   :  { %v147_v34 = vmul.f32 %v181_v32, %v134_v31 }
 0x145   :  { %v139_v33 = vpop.permute.xlu1 %138 }
 0x146   :  { %v148_v37 = vmul.f32 %v181_v32, %v139_v33 }
 0x1b0   :  { %v121_v35 = vpop.f32.mrb[0].mxu0 }
 0x1b1   :  { %v149_v38 = vmul.f32 %v147_v34, %v121_v35  ;;  %v192_v39 = vpop.f32.mrb[1].mxu0 }
 0x1b2   :  { %v124_v40 = vpop.f32.mrb[2].mxu0 }
 0x1b3   :  { %v158_v41 = vadd.f32 %v182_v36, %v149_v38  ;;  %v150_v42 = vmul.f32 %v148_v37, %v124_v40  ;;  %v193_v43 = vpop.f32.mrb[3].mxu0 }
 0x1b5   :  { %160 = vst [vmem:[#allocation9] sm:$0xff] %v158_v41  ;;  %v159_v44 = vadd.f32 %v182_v36, %v150_v42 }
 0x1b7   :  { %161 = vst [vmem:[#allocation9 + $0x8] sm:$0xff] %v159_v44 }
 0x1b8   :  { %265 = shalt.err (!%p262_p6)
}
 0x1b9   :  { %s266_s20 = scalar_lea.hbm %s371_s4, 256 }
 0x1ba   :  { %p267_p7 = scmp.ne.s32.totalorder %s371_s4, %s266_s20  ;;  %p270_p8 = scmp.lt.u32.totalorder %s266_s20, %s371_s4 }
 0x1bc   :  { %p272_p9 = pnand %p270_p8, %p267_p7 }
 0x1be   :  { %275 = shalt.err (!%p272_p9)
}
 0x1bf   :  { %173 = dma.vmem_to_hbm [thread:$0]  %s168_s18, 256, %s371_s4, [#allocation6], %s283_s25, %s283_s25, %s284_s26  }
 0x1c0   :  { %280 = dma.done.wait [#allocation6], 256  }
 0x1c1   :  { %281 = vsyncadd [#allocation6], 4294967040 }
 0x1c2   :  { %177 = vsyncpa [#allocation5], 1 }
 0x1c3   :  { %178 = vsyncpa [#allocation8], 1 }
 0x1c4   :  { %179 = vsyncpa [#allocation6], 1 }

</bundles_post_ra>
